<compile_context>
chip_gen: v5e
topology: v5e:2x2
jax: 0.10.0
libtpu: 0.0.40
codegen_flags: <defaults>
</compile_context>

<pallas_src>
import jax
import jax.numpy as jnp
from jax.experimental import pallas as pl
from jax.experimental.pallas import tpu as pltpu

_LANES_MAX = 1024                    # cap on lane-dense last dim (multiple of 128)
_VMEM_BYTES_PER_BUFFER = 4 << 20     # 4 MiB per tile buffer (4 live buffers -> 16 MiB)
_MIN_PALLAS_ELEMS = 1 << 16          # below this, a plain XLA elementwise op wins


def _zero_mul_kernel(pred_ref, out_ref):
    # Elementwise multiply by zero — mirrors `pred * 0` exactly (shape, dtype,
    # NaN/Inf propagation).
    out_ref[...] = pred_ref[...] * jnp.zeros((), dtype=pred_ref.dtype)


def _round_up(a, b):
    return (a + b - 1) // b * b


def _largest_lane_cols(n):
    """Largest multiple-of-128 divisor of n, capped at _LANES_MAX."""
    m = n // 128
    for d in range(min(_LANES_MAX // 128, m), 0, -1):
        if m % d == 0:
            return d * 128
    return 128


def _pick_tile_rows(rows, cols, itemsize):
    """Rows per tile: >=4 grid steps for pipelining, <=4 MiB per buffer."""
    sublane = {4: 8, 2: 16, 1: 32}.get(itemsize, 8)
    if rows <= 4 * sublane:
        # Tiny: one full-extent block (legal: block dims == array dims).
        return rows
    quarter = _round_up(pl.cdiv(rows, 4), sublane)              # grid >= 4
    cap = (_VMEM_BYTES_PER_BUFFER // (cols * itemsize)) // sublane * sublane
    cap = max(sublane, cap)                                     # VMEM budget
    return max(sublane, min(quarter, cap))


def _zero_like_xla(pred):
    # Fused XLA fallback; identical semantics to `pred * 0`.
    return pred * jnp.zeros((), dtype=pred.dtype)


def always_zero_loss(pred, target=None, weight=None, avg_factor=None,
                     reduction_override=None, use_pallas=None, **kwargs):
    """Pallas implementation of AlwaysZeroLoss.forward: returns pred * 0."""
    orig_shape = pred.shape
    dtype = pred.dtype
    n = pred.size

    # Empty tensors: nothing to compute.
    if n == 0:
        return jnp.zeros(orig_shape, dtype=dtype)

    # Pallas is only worthwhile when the flat size is a multiple of 128 lanes
    # (no pad/slice HBM passes) and large enough to amortize the launch cost.
    eligible = (n % 128 == 0)
    if use_pallas is None:
        use_pallas = eligible and n >= _MIN_PALLAS_ELEMS
    if use_pallas and not eligible:
        use_pallas = False
    if not use_pallas:
        return _zero_like_xla(pred)

    # ---- lane-dense flattening: (rows, cols) with cols | n, cols % 128 == 0 ----
    cols = _largest_lane_cols(n)
    rows = n // cols
    itemsize = jnp.dtype(dtype).itemsize
    tile_r = _pick_tile_rows(rows, cols, itemsize)
    grid = pl.cdiv(rows, tile_r)        # Pallas masks a partial tail tile

    flat2d = pred.reshape(rows, cols)   # pure metadata reshape (n % cols == 0)

    cost = pl.CostEstimate(
        flops=n,
        transcendentals=0,
        bytes_accessed=2 * n * itemsize,
    )

    out = pl.pallas_call(
        _zero_mul_kernel,
        out_shape=jax.ShapeDtypeStruct((rows, cols), dtype),
        grid=(grid,),
        in_specs=[pl.BlockSpec((tile_r, cols), lambda i: (i, 0))],
        out_specs=pl.BlockSpec((tile_r, cols), lambda i: (i, 0)),
        compiler_params=pltpu.CompilerParams(
            dimension_semantics=("parallel",),
            vmem_limit_bytes=32 << 20,
        ),
        cost_estimate=cost,
    )(flat2d)

    return out.reshape(orig_shape)


if __name__ == "__main__":
    key = jax.random.PRNGKey(0)
    k1, k2, k3 = jax.random.split(key, 3)

    # 1) Small detection-loss-like shape, forced through the Pallas kernel.
    pred = jax.random.normal(k1, (2, 4, 16, 16), dtype=jnp.float32)
    target = jax.random.normal(k2, (2, 4, 16, 16), dtype=jnp.float32)
    loss = jax.block_until_ready(always_zero_loss(pred, target, use_pallas=True))
    assert loss.shape == pred.shape
    assert loss.dtype == pred.dtype
    assert bool(jnp.all(loss == 0.0))

    # IEEE `* 0` semantics: NaN in pred propagates through the kernel.
    pred_nan = pred.at[0, 0, 0, 0].set(jnp.nan)
    loss_nan = jax.block_until_ready(
        always_zero_loss(pred_nan, target, use_pallas=True))
    assert bool(jnp.isnan(loss_nan[0, 0, 0, 0]))
    assert bool(jnp.all(loss_nan[0, 0, 0, 1:] == 0.0))

    # 2) Medium shape: auto-selects the tiled (grid >= 4) pipelined Pallas path.
    pred_big = jax.random.normal(k3, (4, 16, 128, 128), dtype=jnp.float32)
    loss_big = jax.block_until_ready(always_zero_loss(pred_big, pred_big))
    assert loss_big.shape == pred_big.shape
    assert bool(jnp.all(loss_big == 0.0))

    # 3) Ragged / tiny shape: fused XLA fallback (no pad/slice HBM passes).
    pred_odd = jax.random.normal(k1, (3, 5, 7), dtype=jnp.float32)
    loss_odd = jax.block_until_ready(always_zero_loss(pred_odd, None))
    assert loss_odd.shape == pred_odd.shape
    assert bool(jnp.all(loss_odd == 0.0))

    print("KERNEL_OK")
</pallas_src>

<mosaic_0001>
module attributes {stable_mosaic.version = 11 : i64} {
  func.func @_zero_mul_kernel(%arg0: i32, %arg1: memref<2x1024xf32, #tpu.memory_space<vmem>>, %arg2: memref<2x1024xf32, #tpu.memory_space<vmem>>) attributes {dimension_semantics = [#tpu.dimension_semantics<parallel>], iteration_bounds = array<i64: 1>, scalar_prefetch = 0 : i64, scratch_operands = 0 : i64, tpu.core_type = #tpu.core_type<tc>, window_params = [{transform_indices = @transform_0, window_bounds = array<i64: 2, 1024>}, {transform_indices = @transform_1, window_bounds = array<i64: 2, 1024>}]} {
    %c0 = arith.constant 0 : index
    %c0_0 = arith.constant 0 : index
    %0 = vector.load %arg1[%c0, %c0_0] : memref<2x1024xf32, #tpu.memory_space<vmem>>, vector<2x1024xf32>
    %cst = arith.constant 0.000000e+00 : f32
    %1 = vector.broadcast %cst : f32 to vector<2x1024xf32>
    %2 = arith.mulf %0, %1 : vector<2x1024xf32>
    %c0_1 = arith.constant 0 : index
    %c0_2 = arith.constant 0 : index
    %3 = vector.load %arg2[%c0_1, %c0_2] : memref<2x1024xf32, #tpu.memory_space<vmem>>, vector<2x1024xf32>
    tpu.vector_store %arg2[%c0_1, %c0_2], %2 {strides = array<i32>} : memref<2x1024xf32, #tpu.memory_space<vmem>>, vector<2x1024xf32>,
    return
  }
  func.func @transform_0(%arg0: i32) -> (i32, i32) {
    %c0_i32 = arith.constant 0 : i32
    %c0_i32_0 = arith.constant 0 : i32
    return %arg0, %c0_i32 : i32, i32
  }
  func.func @transform_1(%arg0: i32) -> (i32, i32) {
    %c0_i32 = arith.constant 0 : i32
    %c0_i32_0 = arith.constant 0 : i32
    return %arg0, %c0_i32 : i32, i32
  }
}

</mosaic_0001>

<bundles_post_ra>
// kernel: tpu_custom_call.1
= control target key start
LH: loop header
LB: loop body
LE: loop exit
PB: predicated region body
PF: predicated region fallthrough
CT: control target
= control target key end

     0   :  { %6 = vsyncpa [#allocation3], 0  ;;  %s118_s0 = inlined_call_operand.hbm [shape: f32[2,1024], index: 0, kind: input, shape index: {}]   ;;  %s119_s1 = inlined_call_operand.hbm [shape: f32[2,1024], index: 1, kind: output, shape index: {}]  }
   0x1   :  { %7 = vsyncpa [#allocation4], 0  ;;  %s13_s8 = sshll.u32 %s118_s0, 4  ;;  %s100_s9 = smov [#allocation2]   ;;  %s14_s8 = int_to_ptr.hbm [resolvable:$true] %s13_s8 }
   0x2   :  { %s15_s10 = sshll.u32 %s100_s9, 4  ;;  %s16_s10 = int_to_ptr.vmem [resolvable:$true] %s15_s10 }
   0x3   :  { %18 = dma.hbm_to_vmem [thread:$0]  %s14_s8, 256, %s16_s10, [#allocation3]  }
   0x4   :  { %96 = dma.done.wait [#allocation3], 256  }
   0x5   :  { %97 = vsyncadd [#allocation3], 4294967040  ;;  %s101_s11 = smov [#allocation5]   ;;  %s36_s15 = sshll.u32 %s119_s1, 4  ;;  %v23_v0 = vld [vmem:[#allocation2] sm:$0xff]  ;;  %v24_v1 = vld [vmem:[#allocation2 + $0x8] sm:$0xff]  ;;  %s37_s15 = int_to_ptr.hbm [resolvable:$true] %s36_s15 }
   0x6   :  { %s34_s12 = sshll.u32 %s101_s11, 4  ;;  %v25_v2 = vmul.f32 0.0, %v23_v0  ;;  %v26_v3 = vmul.f32 0.0, %v24_v1  ;;  %s35_s12 = int_to_ptr.vmem [resolvable:$true] %s34_s12 }
   0x8   :  { %27 = vst [vmem:[#allocation5] sm:$0xff] %v25_v2 }
   0x9   :  { %28 = vst [vmem:[#allocation5 + $0x8] sm:$0xff] %v26_v3 }
   0xa   :  { %39 = dma.vmem_to_hbm [thread:$0]  %s35_s12, 256, %s37_s15, [#allocation4]  }
   0xb   :  { %98 = dma.done.wait [#allocation4], 256  }
   0xc   :  { %99 = vsyncadd [#allocation4], 4294967040 }
   0xd   :  { %44 = vsyncpa [#allocation3], 1 }
   0xe   :  { %45 = vsyncpa [#allocation4], 1 }

</bundles_post_ra>
